<compile_context>
chip_gen: v5e
topology: v5e:2x2
jax: 0.10.0
libtpu: 0.0.40
codegen_flags: <defaults>
</compile_context>

<pallas_src>
import functools

import jax
import jax.numpy as jnp
from jax.experimental import pallas as pl
from jax.experimental.pallas import tpu as pltpu

LANE = 128      # vreg lane width / MXU-friendly feature granularity
SUBLANE = 8     # f32 sublane granularity


def _round_up(n, m):
    return ((n + m - 1) // m) * m


def _make_fused_mlp_kernel(n_layers):
    """Fused [Linear -> ReLU] x n_layers. Refs: x, (W1,b1), ..., (Wn,bn), out.

    All operands are whole-array VMEM blocks; the chained activation `h` stays
    in vregs/VMEM between layers (no HBM writeback of intermediates).
    """
    def kernel(*refs):
        x_ref = refs[0]
        o_ref = refs[-1]
        h = x_ref[...]
        for i in range(n_layers):
            w_ref = refs[1 + 2 * i]   # (Din_pad, Dout_pad), pre-transposed
            b_ref = refs[2 + 2 * i]   # (1, Dout_pad)
            h = jnp.dot(h, w_ref[...], preferred_element_type=jnp.float32)
            h = jnp.maximum(h + b_ref[...], 0.0)   # bias broadcast + ReLU (VPU)
        o_ref[...] = h.astype(o_ref.dtype)
    return kernel


def init_full_connect_params(key, neurons, dtype=jnp.float32):
    """Deterministic params mirroring FullConnectNN.__init__ layer structure.

    torch.nn.Linear default init: U(-1/sqrt(in), 1/sqrt(in)) for W and b.
    """
    params = []
    input_neuron = neurons[0]
    for output_neuron in neurons:          # len(neurons) layers, like the module
        key, kw, kb = jax.random.split(key, 3)
        bound = 1.0 / (input_neuron ** 0.5)
        W = jax.random.uniform(kw, (output_neuron, input_neuron), dtype,
                               minval=-bound, maxval=bound)
        b = jax.random.uniform(kb, (output_neuron,), dtype,
                               minval=-bound, maxval=bound)
        params.append((W, b))
        input_neuron = output_neuron
    return params


def pack_params_for_kernel(params):
    """One-time prep (hoisted out of the hot path):
    transpose W -> (in, out) and zero-pad both feature dims to 128 lanes so
    every matmul / store in the kernel is lane-dense."""
    packed = []
    for W, b in params:
        dout, din = W.shape
        din_p, dout_p = _round_up(din, LANE), _round_up(dout, LANE)
        w_t = jnp.zeros((din_p, dout_p), W.dtype).at[:din, :dout].set(W.T)
        b_p = jnp.zeros((1, dout_p), b.dtype).at[0, :dout].set(b)
        packed.append((w_t, b_p))
    return packed


def full_connect_nn_forward(x, packed_params, out_dim):
    """Pallas forward for FullConnectNN (inference mode; dropout is identity)."""
    n_layers = len(packed_params)
    B, Din = x.shape
    B_p = _round_up(B, SUBLANE)
    Din_p = packed_params[0][0].shape[0]
    Dout_p = packed_params[-1][0].shape[1]

    # Lane-dense, sublane-aligned input slab (zero padding keeps math exact).
    x_p = jnp.zeros((B_p, Din_p), x.dtype).at[:B, :Din].set(x)

    flat_inputs = [x_p]
    for w_t, b_p in packed_params:
        flat_inputs.append(w_t)
        flat_inputs.append(b_p)

    out_p = pl.pallas_call(
        _make_fused_mlp_kernel(n_layers),
        out_shape=jax.ShapeDtypeStruct((B_p, Dout_p), x.dtype),
        in_specs=[pl.BlockSpec(memory_space=pltpu.MemorySpace.VMEM)]
                 * len(flat_inputs),
        out_specs=pl.BlockSpec(memory_space=pltpu.MemorySpace.VMEM),
        # Tiny footprint (<1 MiB); explicit limit keeps headroom even on
        # v7x's 64 MiB VMEM if hidden widths are scaled up.
        compiler_params=pltpu.CompilerParams(vmem_limit_bytes=32 * 1024 * 1024),
    )(*flat_inputs)

    # Slice padded batch rows / lanes off outside the kernel.
    return out_p[:B, :out_dim]


if __name__ == "__main__":
    key = jax.random.PRNGKey(0)
    kx, kp = jax.random.split(key)

    neurons = [32, 64, 16]        # -> layers: 32->32, 32->64, 64->16
    batch = 8
    x = jax.random.normal(kx, (batch, neurons[0]), dtype=jnp.float32)

    params = init_full_connect_params(kp, neurons)
    packed = pack_params_for_kernel(params)        # hoisted transpose/pad

    forward = jax.jit(
        functools.partial(full_connect_nn_forward, out_dim=neurons[-1]))

    out = forward(x, packed)
    out = jax.block_until_ready(out)

    # Sanity check against a plain-JAX reference of the same forward pass.
    ref = x
    for W, b in params:
        ref = jnp.maximum(ref @ W.T + b, 0.0)
    assert out.shape == (batch, neurons[-1])
    assert jnp.allclose(out, ref, atol=1e-5, rtol=1e-5)

    print("KERNEL_OK")
</pallas_src>

<mosaic_0001>
module attributes {stable_mosaic.version = 11 : i64} {
  func.func @kernel(%arg0: memref<8x128xf32, #tpu.memory_space<vmem>>, %arg1: memref<128x128xf32, #tpu.memory_space<vmem>>, %arg2: memref<1x128xf32, #tpu.memory_space<vmem>>, %arg3: memref<128x128xf32, #tpu.memory_space<vmem>>, %arg4: memref<1x128xf32, #tpu.memory_space<vmem>>, %arg5: memref<128x128xf32, #tpu.memory_space<vmem>>, %arg6: memref<1x128xf32, #tpu.memory_space<vmem>>, %arg7: memref<8x128xf32, #tpu.memory_space<vmem>>) attributes {dimension_semantics = [], scalar_prefetch = 0 : i64, scratch_operands = 0 : i64, tpu.core_type = #tpu.core_type<tc>} {
    %c0 = arith.constant 0 : index
    %c0_0 = arith.constant 0 : index
    %0 = vector.load %arg0[%c0, %c0_0] : memref<8x128xf32, #tpu.memory_space<vmem>>, vector<8x128xf32>
    %c0_1 = arith.constant 0 : index
    %c0_2 = arith.constant 0 : index
    %1 = vector.load %arg1[%c0_1, %c0_2] : memref<128x128xf32, #tpu.memory_space<vmem>>, vector<128x128xf32>
    %cst = arith.constant dense<0.000000e+00> : vector<8x128xf32>
    %2 = tpu.matmul %0, %1, %cst {dimension_numbers = #tpu.dot_dimension_numbers<[1], [0], [0], [1], [0, 0, 1, 1], [], []>} : vector<8x128xf32>, vector<128x128xf32>, vector<8x128xf32> -> vector<8x128xf32>
    %c0_3 = arith.constant 0 : index
    %c0_4 = arith.constant 0 : index
    %3 = vector.load %arg2[%c0_3, %c0_4] : memref<1x128xf32, #tpu.memory_space<vmem>>, vector<1x128xf32>
    %4 = vector.broadcast %3 : vector<1x128xf32> to vector<8x128xf32>
    %5 = arith.addf %2, %4 : vector<8x128xf32>
    %cst_5 = arith.constant 0.000000e+00 : f32
    %6 = vector.broadcast %cst_5 : f32 to vector<8x128xf32>
    %7 = arith.maximumf %5, %6 : vector<8x128xf32>
    %c0_6 = arith.constant 0 : index
    %c0_7 = arith.constant 0 : index
    %8 = vector.load %arg3[%c0_6, %c0_7] : memref<128x128xf32, #tpu.memory_space<vmem>>, vector<128x128xf32>
    %cst_8 = arith.constant dense<0.000000e+00> : vector<8x128xf32>
    %9 = tpu.matmul %7, %8, %cst_8 {dimension_numbers = #tpu.dot_dimension_numbers<[1], [0], [0], [1], [0, 0, 1, 1], [], []>} : vector<8x128xf32>, vector<128x128xf32>, vector<8x128xf32> -> vector<8x128xf32>
    %c0_9 = arith.constant 0 : index
    %c0_10 = arith.constant 0 : index
    %10 = vector.load %arg4[%c0_9, %c0_10] : memref<1x128xf32, #tpu.memory_space<vmem>>, vector<1x128xf32>
    %11 = vector.broadcast %10 : vector<1x128xf32> to vector<8x128xf32>
    %12 = arith.addf %9, %11 : vector<8x128xf32>
    %cst_11 = arith.constant 0.000000e+00 : f32
    %13 = vector.broadcast %cst_11 : f32 to vector<8x128xf32>
    %14 = arith.maximumf %12, %13 : vector<8x128xf32>
    %c0_12 = arith.constant 0 : index
    %c0_13 = arith.constant 0 : index
    %15 = vector.load %arg5[%c0_12, %c0_13] : memref<128x128xf32, #tpu.memory_space<vmem>>, vector<128x128xf32>
    %cst_14 = arith.constant dense<0.000000e+00> : vector<8x128xf32>
    %16 = tpu.matmul %14, %15, %cst_14 {dimension_numbers = #tpu.dot_dimension_numbers<[1], [0], [0], [1], [0, 0, 1, 1], [], []>} : vector<8x128xf32>, vector<128x128xf32>, vector<8x128xf32> -> vector<8x128xf32>
    %c0_15 = arith.constant 0 : index
    %c0_16 = arith.constant 0 : index
    %17 = vector.load %arg6[%c0_15, %c0_16] : memref<1x128xf32, #tpu.memory_space<vmem>>, vector<1x128xf32>
    %18 = vector.broadcast %17 : vector<1x128xf32> to vector<8x128xf32>
    %19 = arith.addf %16, %18 : vector<8x128xf32>
    %cst_17 = arith.constant 0.000000e+00 : f32
    %20 = vector.broadcast %cst_17 : f32 to vector<8x128xf32>
    %21 = arith.maximumf %19, %20 : vector<8x128xf32>
    %c0_18 = arith.constant 0 : index
    %c0_19 = arith.constant 0 : index
    %22 = vector.load %arg7[%c0_18, %c0_19] : memref<8x128xf32, #tpu.memory_space<vmem>>, vector<8x128xf32>
    tpu.vector_store %arg7[%c0_18, %c0_19], %21 {strides = array<i32>} : memref<8x128xf32, #tpu.memory_space<vmem>>, vector<8x128xf32>,
    return
  }
}

</mosaic_0001>

<bundles_post_ra>
// kernel: full_connect_nn_forward.1
= control target key start
LH: loop header
LB: loop body
LE: loop exit
PB: predicated region body
PF: predicated region fallthrough
CT: control target
= control target key end

     0   :  { %12 = vsyncpa [#allocation3], 0  ;;  %s398_s0 = inlined_call_operand.vmem [shape: f32[8,128], index: 0, kind: input, shape index: {}]   ;;  %s399_s1 = inlined_call_operand.hbm [shape: f32[128,128], index: 1, kind: input, shape index: {}]   ;;  %s400_s2 = inlined_call_operand.vmem [shape: f32[1,128], index: 2, kind: input, shape index: {}]   ;;  %s401_s3 = inlined_call_operand.hbm [shape: f32[128,128], index: 3, kind: input, shape index: {}]   ;;  %s402_s4 = inlined_call_operand.vmem [shape: f32[1,128], index: 4, kind: input, shape index: {}]   ;;  %s403_s5 = inlined_call_operand.hbm [shape: f32[128,128], index: 5, kind: input, shape index: {}]   ;;  %s404_s6 = inlined_call_operand.vmem [shape: f32[1,128], index: 6, kind: input, shape index: {}]   ;;  %s405_s7 = inlined_call_operand.hbm [shape: f32[8,128], index: 7, kind: output, shape index: {}]  }
   0x1   :  { %13 = vsyncpa [#allocation6], 0 }
   0x2   :  { %14 = vsyncpa [#allocation4], 0  ;;  %s36_s26 = sshll.u32 %s401_s3, 4  ;;  %s328_s27 = smov [#allocation5]   ;;  %s37_s26 = int_to_ptr.hbm [resolvable:$true] %s36_s26 }
   0x3   :  { %s38_s28 = sshll.u32 %s328_s27, 4  ;;  %s21_s8 = sshll.u32 %s399_s1, 4  ;;  %s39_s28 = int_to_ptr.vmem [resolvable:$true] %s38_s28  ;;  %s22_s8 = int_to_ptr.hbm [resolvable:$true] %s21_s8 }
   0x4   :  { %s329_s9 = smov 128   ;;  %s330_s10 = smov 8  }
   0x5   :  { %44 = dma.hbm_to_vmem [thread:$0]  %s37_s26, 2048, %s39_s28, [#allocation6], %s329_s9, %s329_s9, %s330_s10  }
   0x6   :  { %s331_s11 = smov [#allocation2]   ;;  %s51_s15 = sshll.u32 %s403_s5, 4  ;;  %s52_s15 = int_to_ptr.hbm [resolvable:$true] %s51_s15 }
   0x7   :  { %s23_s12 = sshll.u32 %s331_s11, 4  ;;  %s332_s3 = smov [#allocation7]   ;;  %s24_s12 = int_to_ptr.vmem [resolvable:$true] %s23_s12 }
   0x8   :  { %29 = dma.hbm_to_vmem [thread:$0]  %s22_s8, 2048, %s24_s12, [#allocation3], %s329_s9, %s329_s9, %s330_s10  }
   0x9   :  { %s53_s16 = sshll.u32 %s332_s3, 4  ;;  %s54_s16 = int_to_ptr.vmem [resolvable:$true] %s53_s16 }
   0xa   :  { %59 = dma.hbm_to_vmem [thread:$0]  %s52_s15, 2048, %s54_s16, [#allocation6], %s329_s9, %s329_s9, %s330_s10  }
   0xb   :  { %322 = dma.done.wait [#allocation3], 2048  }
   0xc   :  { %323 = vsyncadd [#allocation3], 4294965248 }
   0xd   :  { %324 = dma.done.wait [#allocation6], 4096  }
   0xe   :  { %325 = vsyncadd [#allocation6], 4294963200  ;;  %v90_v0 = vld [vmem:[#allocation2 + $0x78] sm:$0xff]  ;;  %v89_v1 = vld [vmem:[#allocation2 + $0x70] sm:$0xff]  ;;  %s333_s21 = smov [#allocation8]   ;;  %s206_s25 = sshll.u32 %s405_s7, 4  ;;  %s207_s25 = int_to_ptr.hbm [resolvable:$true] %s206_s25 }
   0xf   :  { %95 = vmatpush.msra.mxu0 %v90_v0  ;;  %v88_v2 = vld [vmem:[#allocation2 + $0x68] sm:$0xff]  ;;  %v87_v3 = vld [vmem:[#allocation2 + $0x60] sm:$0xff]  ;;  %v131_v4 = vld [vmem:[#allocation5 + $0x78] sm:$0xff]  ;;  %s204_s22 = sshll.u32 %s333_s21, 4  ;;  %s205_s22 = int_to_ptr.vmem [resolvable:$true] %s204_s22 }
  0x10   :  { %v86_v5 = vld [vmem:[#allocation2 + $0x58] sm:$0xff]  ;;  %136 = vmatpush.msra.mxu1 %v131_v4  ;;  %v130_v6 = vld [vmem:[#allocation5 + $0x70] sm:$0xff]  ;;  %v129_v7 = vld [vmem:[#allocation5 + $0x68] sm:$0xff] }
  0x11   :  { %96 = vmatpush.msra.mxu0 %v89_v1  ;;  %v85_v8 = vld [vmem:[#allocation2 + $0x50] sm:$0xff]  ;;  %v128_v9 = vld [vmem:[#allocation5 + $0x60] sm:$0xff]  ;;  %v84_v10 = vld [vmem:[#allocation2 + $0x48] sm:$0xff] }
  0x12   :  { %137 = vmatpush.msra.mxu1 %v130_v6  ;;  %v127_v11 = vld [vmem:[#allocation5 + $0x58] sm:$0xff]  ;;  %v83_v12 = vld [vmem:[#allocation2 + $0x40] sm:$0xff]  ;;  %v126_v13 = vld [vmem:[#allocation5 + $0x50] sm:$0xff] }
  0x13   :  { %97 = vmatpush.msra.mxu0 %v88_v2  ;;  %v82_v14 = vld [vmem:[#allocation2 + $0x38] sm:$0xff]  ;;  %v125_v15 = vld [vmem:[#allocation5 + $0x48] sm:$0xff]  ;;  %v81_v16 = vld [vmem:[#allocation2 + $0x30] sm:$0xff] }
  0x14   :  { %138 = vmatpush.msra.mxu1 %v129_v7  ;;  %v124_v17 = vld [vmem:[#allocation5 + $0x40] sm:$0xff]  ;;  %v80_v18 = vld [vmem:[#allocation2 + $0x28] sm:$0xff]  ;;  %v123_v19 = vld [vmem:[#allocation5 + $0x38] sm:$0xff] }
  0x15   :  { %98 = vmatpush.msra.mxu0 %v87_v3  ;;  %v79_v20 = vld [vmem:[#allocation2 + $0x20] sm:$0xff]  ;;  %v122_v21 = vld [vmem:[#allocation5 + $0x30] sm:$0xff]  ;;  %v78_v22 = vld [vmem:[#allocation2 + $0x18] sm:$0xff] }
  0x16   :  { %139 = vmatpush.msra.mxu1 %v128_v9  ;;  %v121_v23 = vld [vmem:[#allocation5 + $0x28] sm:$0xff]  ;;  %v77_v24 = vld [vmem:[#allocation2 + $0x10] sm:$0xff]  ;;  %v120_v25 = vld [vmem:[#allocation5 + $0x20] sm:$0xff] }
  0x17   :  { %99 = vmatpush.msra.mxu0 %v86_v5  ;;  %v76_v26 = vld [vmem:[#allocation2 + $0x8] sm:$0xff]  ;;  %v119_v27 = vld [vmem:[#allocation5 + $0x18] sm:$0xff]  ;;  %v75_v28 = vld [vmem:[#allocation2] sm:$0xff] }
  0x18   :  { %140 = vmatpush.msra.mxu1 %v127_v11  ;;  %v74_v29 = vld [vmem:[%s398_s0] sm:$0xff]  ;;  %v118_v30 = vld [vmem:[#allocation5 + $0x10] sm:$0xff]  ;;  %v117_v31 = vld [vmem:[#allocation5 + $0x8] sm:$0xff] }
  0x19   :  { %100 = vmatpush.msra.mxu0 %v85_v8  ;;  %v116_v32 = vld [vmem:[#allocation5] sm:$0xff]  ;;  %v172_v33 = vld [vmem:[#allocation7 + $0x78] sm:$0xff]  ;;  %v171_v34 = vld [vmem:[#allocation7 + $0x70] sm:$0xff] }
  0x1a   :  { %141 = vmatpush.msra.mxu1 %v126_v13  ;;  %177 = vmatpush.msra.mxu2 %v172_v33  ;;  %v170_v35 = vld [vmem:[#allocation7 + $0x68] sm:$0xff]  ;;  %v169_v36 = vld [vmem:[#allocation7 + $0x60] sm:$0xff]  ;;  %v168_v37 = vld [vmem:[#allocation7 + $0x58] sm:$0xff] }
  0x1b   :  { %101 = vmatpush.msra.mxu0 %v84_v10  ;;  %v167_v38 = vld [vmem:[#allocation7 + $0x50] sm:$0xff]  ;;  %v166_v39 = vld [vmem:[#allocation7 + $0x48] sm:$0xff]  ;;  %v165_v40 = vld [vmem:[#allocation7 + $0x40] sm:$0xff] }
  0x1c   :  { %142 = vmatpush.msra.mxu1 %v125_v15  ;;  %178 = vmatpush.msra.mxu2 %v171_v34  ;;  %v164_v41 = vld [vmem:[#allocation7 + $0x38] sm:$0xff]  ;;  %v163_v42 = vld [vmem:[#allocation7 + $0x30] sm:$0xff]  ;;  %v162_v43 = vld [vmem:[#allocation7 + $0x28] sm:$0xff] }
  0x1d   :  { %102 = vmatpush.msra.mxu0 %v83_v12  ;;  %v161_v44 = vld [vmem:[#allocation7 + $0x20] sm:$0xff]  ;;  %v160_v45 = vld [vmem:[#allocation7 + $0x18] sm:$0xff]  ;;  %v159_v50 = vld [vmem:[#allocation7 + $0x10] sm:$0xff] }
  0x1e   :  { %143 = vmatpush.msra.mxu1 %v124_v17  ;;  %179 = vmatpush.msra.mxu2 %v170_v35  ;;  %v223_v46 = vld [vmem:[%s400_s2] ss:$0 sm:$0xff]  ;;  %v158_v51 = vld [vmem:[#allocation7 + $0x8] sm:$0xff] }
  0x1f   :  { %103 = vmatpush.msra.mxu0 %v82_v14  ;;  %v157_v52 = vld [vmem:[#allocation7] sm:$0xff] }
  0x20   :  { %144 = vmatpush.msra.mxu1 %v123_v19  ;;  %180 = vmatpush.msra.mxu2 %v169_v36  ;;  %v224_v53 = vld [vmem:[%s402_s4] ss:$0 sm:$0xff] }
  0x21   :  { %104 = vmatpush.msra.mxu0 %v81_v16  ;;  %v225_v57 = vld [vmem:[%s404_s6] ss:$0 sm:$0xff] }
  0x22   :  { %145 = vmatpush.msra.mxu1 %v122_v21  ;;  %181 = vmatpush.msra.mxu2 %v168_v37 }
  0x23   :  { %105 = vmatpush.msra.mxu0 %v80_v18 }
  0x24   :  { %146 = vmatpush.msra.mxu1 %v121_v23  ;;  %182 = vmatpush.msra.mxu2 %v167_v38 }
  0x25   :  { %106 = vmatpush.msra.mxu0 %v79_v20 }
  0x26   :  { %147 = vmatpush.msra.mxu1 %v120_v25  ;;  %183 = vmatpush.msra.mxu2 %v166_v39 }
  0x27   :  { %107 = vmatpush.msra.mxu0 %v78_v22 }
  0x28   :  { %148 = vmatpush.msra.mxu1 %v119_v27  ;;  %184 = vmatpush.msra.mxu2 %v165_v40 }
  0x29   :  { %108 = vmatpush.msra.mxu0 %v77_v24 }
  0x2a   :  { %149 = vmatpush.msra.mxu1 %v118_v30  ;;  %185 = vmatpush.msra.mxu2 %v164_v41 }
  0x2b   :  { %109 = vmatpush.msra.mxu0 %v76_v26 }
  0x2c   :  { %150 = vmatpush.msra.mxu1 %v117_v31  ;;  %186 = vmatpush.msra.mxu2 %v163_v42 }
  0x2d   :  { %110 = vmatpush.msra.mxu0 %v75_v28 }
  0x2e   :  { %111 = vmatmul.f32.vlgmr.msra.gmra.mxu0 %v74_v29  ;;  %151 = vmatpush.msra.mxu1 %v116_v32 }
  0x2f   :  { %187 = vmatpush.msra.mxu2 %v162_v43 }
  0x31   :  { %188 = vmatpush.msra.mxu2 %v161_v44 }
  0x33   :  { %189 = vmatpush.msra.mxu2 %v160_v45 }
  0x35   :  { %190 = vmatpush.msra.mxu2 %v159_v50 }
  0x37   :  { %191 = vmatpush.msra.mxu2 %v158_v51 }
  0x39   :  { %192 = vmatpush.msra.mxu2 %v157_v52 }
  0xab   :  { %v112_v47 = vpop.f32.mrf.mxu0 }
  0xac   :  { %v113_v48 = vadd.f32 %v223_v46, %v112_v47 }
  0xae   :  { %v115_v49 = vmax.f32 %v113_v48, 0.0 }
  0xb0   :  { %152 = vmatmul.f32.vlgmr.msra.gmra.mxu1 %v115_v49 }
 0x12d   :  { %v153_v54 = vpop.f32.mrf.mxu1 }
 0x12e   :  { %v154_v55 = vadd.f32 %v224_v53, %v153_v54 }
 0x130   :  { %v156_v56 = vmax.f32 %v154_v55, 0.0 }
 0x132   :  { %193 = vmatmul.f32.vlgmr.msra.gmra.mxu2 %v156_v56 }
 0x1b5   :  { %v194_v58 = vpop.f32.mrf.mxu2 }
 0x1b6   :  { %v195_v59 = vadd.f32 %v225_v57, %v194_v58 }
 0x1b8   :  { %v197_v60 = vmax.f32 %v195_v59, 0.0 }
 0x1ba   :  { %198 = vst [vmem:[#allocation8] sm:$0xff] %v197_v60 }
 0x1bb   :  { %209 = dma.vmem_to_hbm [thread:$0]  %s205_s22, 128, %s207_s25, [#allocation4]  }
 0x1bc   :  { %326 = dma.done.wait [#allocation4], 128  }
 0x1bd   :  { %327 = vsyncadd [#allocation4], 4294967168 }
 0x1be   :  { %214 = vsyncpa [#allocation3], 1 }
 0x1bf   :  { %215 = vsyncpa [#allocation6], 1 }
 0x1c0   :  { %216 = vsyncpa [#allocation4], 1 }

</bundles_post_ra>
